<compile_context>
chip_gen: v5e
topology: v5e:2x2
jax: 0.10.0
libtpu: 0.0.40
codegen_flags: <defaults>
</compile_context>

<pallas_src>
import functools

import jax
import jax.numpy as jnp
from jax.experimental import pallas as pl
from jax.experimental.pallas import tpu as pltpu


def _arm_kernel(x_ref, w_ref, b_ref, o_ref, sum_ref, s_ref, *, hw, chunk):
    # x_ref: (1, C, chunk)   w_ref: (C, C)   b_ref: (C, 1)   o_ref: (1, C, chunk)
    # sum_ref: (C, 1) f32 scratch (per-channel sum), s_ref: (C, 1) f32 scratch (scale)
    phase = pl.program_id(1)   # 0: accumulate channel sums, 1: rescale + store
    ci = pl.program_id(2)      # HW-chunk index

    @pl.when(jnp.logical_and(phase == 0, ci == 0))
    def _init():
        sum_ref[...] = jnp.zeros_like(sum_ref)

    @pl.when(phase == 0)
    def _accumulate():
        xb = x_ref[0].astype(jnp.float32)          # single cast of the tile, (C, chunk)
        if hw % chunk:                              # mask padded lanes of the tail chunk
            col = ci * chunk + jax.lax.broadcasted_iota(jnp.int32, xb.shape, 1)
            xb = jnp.where(col < hw, xb, 0.0)
        sum_ref[...] += jnp.sum(xb, axis=-1, keepdims=True)

    @pl.when(jnp.logical_and(phase == 1, ci == 0))
    def _scale():
        # Tiny (C,C)@(C,1) matvec + sigmoid, executed once per batch (not per chunk).
        mean = sum_ref[...] * (1.0 / hw)            # divide by the *true* H*W
        z = jnp.dot(w_ref[...].astype(jnp.float32), mean,
                    preferred_element_type=jnp.float32) + b_ref[...]
        s_ref[...] = jax.nn.sigmoid(z)              # (C, 1) f32

    @pl.when(phase == 1)
    def _rescale():
        # Rescale in the native input dtype (halves vreg/store traffic for bf16 inputs).
        o_ref[0] = x_ref[0] * s_ref[...].astype(o_ref.dtype)


def _choose_chunk_hw(c, hw, itemsize, target_block_bytes=2 << 20):
    """Largest lane extent (multiple of 128) giving ~target_block_bytes per (C, chunk) tile."""
    lanes = max(target_block_bytes // max(c * itemsize, 1), 128)
    lanes = (lanes // 128) * 128
    if hw <= lanes:
        return int(hw)          # single chunk spanning the full spatial extent
    return int(lanes)


def attention_refinement(x_nchw, weight, bias, *, chunk_hw=None, donate_input=False):
    """ARM forward. x_nchw: (B, C, H, W); weight: (C_out=C, C_in=C); bias: (C,)."""
    B, C, H, W = x_nchw.shape
    HW = H * W
    itemsize = jnp.dtype(x_nchw.dtype).itemsize

    if chunk_hw is None:
        chunk = _choose_chunk_hw(C, HW, itemsize)
    else:
        chunk = min(int(chunk_hw), HW)
        if chunk != HW and chunk % 128:
            raise ValueError("chunk_hw must be a multiple of 128 or cover the full H*W")
    nchunk = pl.cdiv(HW, chunk)

    x_flat = x_nchw.reshape(B, C, HW)
    bias_col = bias.reshape(C, 1).astype(jnp.float32)

    # Explicit VMEM budget: double-buffered input + output tiles (+ weights + slack).
    c_pad = 8 * pl.cdiv(C, 8)
    lane_pad = 128 * pl.cdiv(chunk, 128)
    blk_bytes = c_pad * lane_pad * itemsize
    w_bytes = c_pad * max(128 * pl.cdiv(C, 128), 128) * jnp.dtype(weight.dtype).itemsize
    vmem_limit = int(min(max(4 * blk_bytes + w_bytes + (4 << 20), 8 << 20), 48 << 20))

    cost = pl.CostEstimate(
        flops=int(2 * B * C * HW + 2 * B * C * C),
        transcendentals=int(B * C),
        bytes_accessed=int(3 * B * C * HW * itemsize
                           + (C * C + C) * jnp.dtype(weight.dtype).itemsize),
    )

    out_flat = pl.pallas_call(
        functools.partial(_arm_kernel, hw=HW, chunk=chunk),
        out_shape=jax.ShapeDtypeStruct((B, C, HW), x_nchw.dtype),
        grid_spec=pltpu.PrefetchScalarGridSpec(
            num_scalar_prefetch=0,
            grid=(B, 2, nchunk),
            in_specs=[
                pl.BlockSpec((1, C, chunk), lambda b, p, c: (b, 0, c)),
                pl.BlockSpec((C, C), lambda b, p, c: (0, 0)),
                pl.BlockSpec((C, 1), lambda b, p, c: (0, 0)),
            ],
            # Phase 0 pins the output block at chunk 0 (never written -> no garbage
            # write-backs); phase 1 walks the chunks and streams the rescaled tiles out.
            out_specs=pl.BlockSpec((1, C, chunk), lambda b, p, c: (b, 0, p * c)),
            scratch_shapes=[
                pltpu.VMEM((C, 1), jnp.float32),   # per-channel sum accumulator
                pltpu.VMEM((C, 1), jnp.float32),   # sigmoid scale, reused across chunks
            ],
        ),
        compiler_params=pltpu.CompilerParams(
            dimension_semantics=("parallel", "arbitrary", "arbitrary"),
            vmem_limit_bytes=vmem_limit,
        ),
        cost_estimate=cost,
        input_output_aliases=({0: 0} if donate_input else {}),
    )(x_flat, weight, bias_col)

    return out_flat.reshape(B, C, H, W)


def init_params(key, in_channels, out_channels):
    # nn.init.kaiming_normal_(weight, a=1): std = sqrt(2/(1+a^2)) / sqrt(fan_in), a=1 -> gain=1
    fan_in = in_channels
    std = 1.0 / jnp.sqrt(jnp.asarray(fan_in, jnp.float32))
    w = jax.random.normal(key, (out_channels, in_channels), jnp.float32) * std
    b = jnp.zeros((out_channels,), jnp.float32)   # nn.init.constant_(bias, 0)
    return w, b


def _reference(x, w, b):
    # pure-JAX reference
    avg = jnp.mean(x, axis=(2, 3))                      # (B, C)
    z = avg @ w.T + b                                   # (B, C)
    s = jax.nn.sigmoid(z)[:, :, None, None]             # (B, C, 1, 1)
    return x * s


if __name__ == "__main__":
    key = jax.random.PRNGKey(0)
    k_x, k_w, k_x2 = jax.random.split(key, 3)

    # Case 1: spec shapes (HW = 256 -> two lane-dense 128-wide chunks per batch).
    B, C, H, W = 2, 4, 16, 16
    x = jax.random.normal(k_x, (B, C, H, W), jnp.float32)
    weight, bias = init_params(k_w, C, C)

    out = jax.block_until_ready(attention_refinement(x, weight, bias, chunk_hw=128))
    ref = _reference(x, weight, bias)
    assert out.shape == x.shape
    assert jnp.allclose(out, ref, atol=1e-5, rtol=1e-5)

    # Case 2: non-128-aligned spatial extent (14x14 -> HW=196) exercises the masked tail chunk.
    x2 = jax.random.normal(k_x2, (1, C, 14, 14), jnp.float32)
    out2 = jax.block_until_ready(attention_refinement(x2, weight, bias, chunk_hw=128))
    ref2 = _reference(x2, weight, bias)
    assert jnp.allclose(out2, ref2, atol=1e-5, rtol=1e-5)

    print("KERNEL_OK")
</pallas_src>

<mosaic_0001>
module attributes {stable_mosaic.version = 11 : i64} {
  func.func @_arm_kernel(%arg0: i32, %arg1: i32, %arg2: i32, %arg3: memref<1x4x128xf32, #tpu.memory_space<vmem>>, %arg4: memref<4x4xf32, #tpu.memory_space<vmem>>, %arg5: memref<4x1xf32, #tpu.memory_space<vmem>>, %arg6: memref<1x4x128xf32, #tpu.memory_space<vmem>>, %arg7: memref<4x1xf32, #tpu.memory_space<vmem>>, %arg8: memref<4x1xf32, #tpu.memory_space<vmem>>) attributes {dimension_semantics = [#tpu.dimension_semantics<parallel>, #tpu.dimension_semantics<arbitrary>, #tpu.dimension_semantics<arbitrary>], iteration_bounds = array<i64: 2, 2, 2>, scalar_prefetch = 0 : i64, scratch_operands = 2 : i64, tpu.core_type = #tpu.core_type<tc>, window_params = [{transform_indices = @transform_0, window_bounds = array<i64: 1, 4, 128>}, {pipeline_mode = #tpu.pipeline_mode<synchronous>, transform_indices = @transform_1, window_bounds = array<i64: 4, 4>}, {pipeline_mode = #tpu.pipeline_mode<synchronous>, transform_indices = @transform_2, window_bounds = array<i64: 4, 1>}, {transform_indices = @transform_3, window_bounds = array<i64: 1, 4, 128>}]} {
    %c0_i32 = arith.constant 0 : i32
    %0 = arith.cmpi eq, %arg1, %c0_i32 : i32
    %c0_i32_0 = arith.constant 0 : i32
    %1 = arith.cmpi eq, %arg2, %c0_i32_0 : i32
    %2 = arith.andi %0, %1 : i1
    %3 = arith.extui %2 : i1 to i32
    %c0_i32_1 = arith.constant 0 : i32
    %4 = arith.cmpi ne, %3, %c0_i32_1 : i32
    scf.if %4 {
      %cst = arith.constant 0.000000e+00 : f32
      %16 = vector.broadcast %cst : f32 to vector<4x1xf32>
      %c0 = arith.constant 0 : index
      %c0_8 = arith.constant 0 : index
      %17 = vector.load %arg7[%c0, %c0_8] : memref<4x1xf32, #tpu.memory_space<vmem>>, vector<4x1xf32>
      tpu.vector_store %arg7[%c0, %c0_8], %16 {strides = array<i32>} : memref<4x1xf32, #tpu.memory_space<vmem>>, vector<4x1xf32>,
    } else {
    }
    %c0_i32_2 = arith.constant 0 : i32
    %5 = arith.cmpi eq, %arg1, %c0_i32_2 : i32
    %6 = arith.extui %5 : i1 to i32
    %c0_i32_3 = arith.constant 0 : i32
    %7 = arith.cmpi ne, %6, %c0_i32_3 : i32
    scf.if %7 {
      %c0 = arith.constant 0 : index
      %c0_8 = arith.constant 0 : index
      %c0_9 = arith.constant 0 : index
      %16 = vector.load %arg3[%c0, %c0_8, %c0_9] : memref<1x4x128xf32, #tpu.memory_space<vmem>>, vector<1x4x128xf32>
      %17 = vector.shape_cast %16 : vector<1x4x128xf32> to vector<4x128xf32>
      %c0_10 = arith.constant 0 : index
      %c0_11 = arith.constant 0 : index
      %18 = vector.load %arg7[%c0_10, %c0_11] : memref<4x1xf32, #tpu.memory_space<vmem>>, vector<4x1xf32>
      %cst = arith.constant dense<0.000000e+00> : vector<4xf32>
      %19 = vector.multi_reduction <add>, %17, %cst [1] : vector<4x128xf32> to vector<4xf32>
      %20 = vector.shape_cast %19 : vector<4xf32> to vector<4x1xf32>
      %21 = arith.addf %18, %20 : vector<4x1xf32>
      %c0_12 = arith.constant 0 : index
      %c0_13 = arith.constant 0 : index
      %22 = vector.load %arg7[%c0_12, %c0_13] : memref<4x1xf32, #tpu.memory_space<vmem>>, vector<4x1xf32>
      tpu.vector_store %arg7[%c0_12, %c0_13], %21 {strides = array<i32>} : memref<4x1xf32, #tpu.memory_space<vmem>>, vector<4x1xf32>,
    } else {
    }
    %c1_i32 = arith.constant 1 : i32
    %8 = arith.cmpi eq, %arg1, %c1_i32 : i32
    %c0_i32_4 = arith.constant 0 : i32
    %9 = arith.cmpi eq, %arg2, %c0_i32_4 : i32
    %10 = arith.andi %8, %9 : i1
    %11 = arith.extui %10 : i1 to i32
    %c0_i32_5 = arith.constant 0 : i32
    %12 = arith.cmpi ne, %11, %c0_i32_5 : i32
    scf.if %12 {
      %c0 = arith.constant 0 : index
      %c0_8 = arith.constant 0 : index
      %16 = vector.load %arg7[%c0, %c0_8] : memref<4x1xf32, #tpu.memory_space<vmem>>, vector<4x1xf32>
      %cst = arith.constant 3.906250e-03 : f32
      %17 = vector.broadcast %cst : f32 to vector<4x1xf32>
      %18 = arith.mulf %16, %17 : vector<4x1xf32>
      %c0_9 = arith.constant 0 : index
      %c0_10 = arith.constant 0 : index
      %19 = vector.load %arg4[%c0_9, %c0_10] : memref<4x4xf32, #tpu.memory_space<vmem>>, vector<4x4xf32>
      %cst_11 = arith.constant dense<0.000000e+00> : vector<4x1xf32>
      %20 = tpu.matmul %19, %18, %cst_11 {dimension_numbers = #tpu.dot_dimension_numbers<[1], [0], [0], [1], [0, 0, 1, 1], [], []>} : vector<4x4xf32>, vector<4x1xf32>, vector<4x1xf32> -> vector<4x1xf32>
      %c0_12 = arith.constant 0 : index
      %c0_13 = arith.constant 0 : index
      %21 = vector.load %arg5[%c0_12, %c0_13] : memref<4x1xf32, #tpu.memory_space<vmem>>, vector<4x1xf32>
      %22 = arith.addf %20, %21 : vector<4x1xf32>
      %23 = arith.negf %22 : vector<4x1xf32>
      %24 = math.exp %23 : vector<4x1xf32>
      %cst_14 = arith.constant 1.000000e+00 : f32
      %25 = vector.broadcast %cst_14 : f32 to vector<4x1xf32>
      %26 = arith.addf %25, %24 : vector<4x1xf32>
      %27 = arith.divf %25, %26 : vector<4x1xf32>
      %c0_15 = arith.constant 0 : index
      %c0_16 = arith.constant 0 : index
      %28 = vector.load %arg8[%c0_15, %c0_16] : memref<4x1xf32, #tpu.memory_space<vmem>>, vector<4x1xf32>
      tpu.vector_store %arg8[%c0_15, %c0_16], %27 {strides = array<i32>} : memref<4x1xf32, #tpu.memory_space<vmem>>, vector<4x1xf32>,
    } else {
    }
    %c1_i32_6 = arith.constant 1 : i32
    %13 = arith.cmpi eq, %arg1, %c1_i32_6 : i32
    %14 = arith.extui %13 : i1 to i32
    %c0_i32_7 = arith.constant 0 : i32
    %15 = arith.cmpi ne, %14, %c0_i32_7 : i32
    scf.if %15 {
      %c0 = arith.constant 0 : index
      %c0_8 = arith.constant 0 : index
      %c0_9 = arith.constant 0 : index
      %16 = vector.load %arg3[%c0, %c0_8, %c0_9] : memref<1x4x128xf32, #tpu.memory_space<vmem>>, vector<1x4x128xf32>
      %17 = vector.shape_cast %16 : vector<1x4x128xf32> to vector<4x128xf32>
      %c0_10 = arith.constant 0 : index
      %c0_11 = arith.constant 0 : index
      %18 = vector.load %arg8[%c0_10, %c0_11] : memref<4x1xf32, #tpu.memory_space<vmem>>, vector<4x1xf32>
      %19 = vector.broadcast %18 : vector<4x1xf32> to vector<4x128xf32>
      %20 = arith.mulf %17, %19 : vector<4x128xf32>
      %c0_12 = arith.constant 0 : index
      %c0_13 = arith.constant 0 : index
      %c0_14 = arith.constant 0 : index
      %21 = vector.load %arg6[%c0_12, %c0_13, %c0_14] : memref<1x4x128xf32, #tpu.memory_space<vmem>>, vector<1x4x128xf32>
      %22 = vector.shape_cast %21 : vector<1x4x128xf32> to vector<4x128xf32>
      %23 = vector.shape_cast %20 : vector<4x128xf32> to vector<1x4x128xf32>
      tpu.vector_store %arg6[%c0_12, %c0_13, %c0_14], %23 {strides = array<i32>} : memref<1x4x128xf32, #tpu.memory_space<vmem>>, vector<1x4x128xf32>,
    } else {
    }
    return
  }
  func.func @transform_0(%arg0: i32, %arg1: i32, %arg2: i32) -> (i32, i32, i32) {
    %c0_i32 = arith.constant 0 : i32
    %c0_i32_0 = arith.constant 0 : i32
    return %arg0, %c0_i32, %arg2 : i32, i32, i32
  }
  func.func @transform_1(%arg0: i32, %arg1: i32, %arg2: i32) -> (i32, i32) {
    %c0_i32 = arith.constant 0 : i32
    %c0_i32_0 = arith.constant 0 : i32
    %c0_i32_1 = arith.constant 0 : i32
    return %c0_i32, %c0_i32_0 : i32, i32
  }
  func.func @transform_2(%arg0: i32, %arg1: i32, %arg2: i32) -> (i32, i32) {
    %c0_i32 = arith.constant 0 : i32
    %c0_i32_0 = arith.constant 0 : i32
    %c0_i32_1 = arith.constant 0 : i32
    return %c0_i32, %c0_i32_0 : i32, i32
  }
  func.func @transform_3(%arg0: i32, %arg1: i32, %arg2: i32) -> (i32, i32, i32) {
    %0 = arith.muli %arg1, %arg2 : i32
    %c0_i32 = arith.constant 0 : i32
    %c0_i32_0 = arith.constant 0 : i32
    return %arg0, %c0_i32, %0 : i32, i32, i32
  }
}

</mosaic_0001>

<bundles_post_ra>
// kernel: tpu_custom_call.1
= control target key start
LH: loop header
LB: loop body
LE: loop exit
PB: predicated region body
PF: predicated region fallthrough
CT: control target
= control target key end

     0   :  { %s988_s0 = inlined_call_operand.hbm [shape: f32[2,4,256], index: 0, kind: input, shape index: {}]   ;;  %s989_s1 = inlined_call_operand.vmem [shape: f32[4,4], index: 1, kind: input, shape index: {}]   ;;  %s990_s2 = inlined_call_operand.vmem [shape: f32[4,1], index: 2, kind: input, shape index: {}]   ;;  %s991_s3 = inlined_call_operand.hbm [shape: f32[2,4,256], index: 3, kind: output, shape index: {}]  }
   0x1   :  { %997 = sst [smem:[#allocation16_spill]] %s988_s0 }
   0x2   :  { %8 = vsyncpa [#allocation5], 0 }
   0x3   :  { %10 = vsyncpa [#allocation5 + $0x1], 0 }
   0x4   :  { %11 = vsyncpa [#allocation6], 0 }
   0x5   :  { %13 = vsyncpa [#allocation6 + $0x1], 0  ;;  %s753_s12 = smov 0   ;;  %s755_s13 = smov 0  }
   0x6   :  { %s757_s14 = smov 0   ;;  %s759_s15 = smov 0  }
   0x7   :  { %s761_s16 = smov 0   ;;  %s763_s17 = smov 0  }
   0x8   :  { %s765_s18 = smov 0   ;;  %s767_s19 = smov 0  }
   0x9   :  { %s769_s20 = smov 0   ;;  %s771_s21 = smov 0  }
   0xa   :  { %s773_s22 = smov 0   ;;  %s775_s23 = smov 0  }
   0xb   :  { %s777_s24 = smov 0  }
   0xc LB: > { %998 = sst [smem:[#allocation10_spill]] %s681_s12  ;;  %s416_s25 = sadd.s32 4294967295, %s729_s24   ;;  %s729_s24 = sphi %s777_s24, %s19_s24   ;;  %s725_s23 = sphi %s775_s23, %s1027_s23   ;;  %s721_s22 = sphi %s773_s22, %s1016_s22   ;;  %s717_s21 = sphi %s771_s21, %s1026_s21   ;;  %s713_s20 = sphi %s769_s20, %s1025_s20   ;;  %s709_s19 = sphi %s767_s19, %s1014_s19   ;;  %s705_s18 = sphi %s765_s18, %s1024_s18   ;;  %s701_s17 = sphi %s763_s17, %s1023_s17   ;;  %s697_s16 = sphi %s761_s16, %s1022_s16   ;;  %s693_s15 = sphi %s759_s15, %s1021_s15   ;;  %s689_s14 = sphi %s757_s14, %s1020_s14   ;;  %s685_s13 = sphi %s755_s13, %s1019_s13   ;;  %s681_s12 = sphi %s753_s12, %s1018_s12  }
   0xd   : > { %999 = sst [smem:[#allocation11_spill]] %s721_s22  ;;  %s31_s27 = sadd.s32 1, %s717_s21 }
   0xe   : > { %s34_s28 = sadd.s32 1, %s721_s22  ;;  %p32_p0 = scmp.ge.s32.totalorder %s31_s27, 2 }
   0xf   : > { %s38_s29 = sadd.s32 1, %s725_s23  ;;  %p54_p1 = scmp.ne.s32.totalorder %s701_s17, %s697_s16 }
  0x10   : > { %s1029_s27 = smov (%p32_p0, %s31_s27), 0  ;;  %s1031_s28 = smov (!%p32_p0, %s34_s28), %s721_s22 }
  0x11   : > { %1000 = sst [smem:[#allocation12_spill]] %s1029_s27  ;;  %s43_s4 = ssub.s32 %s717_s21, %s1029_s27 }
  0x12   : > { %p55_p2 = scmp.eq.s32.totalorder %s729_s24, 0  ;;  %p36_p3 = scmp.ge.s32.totalorder %s1031_s28, 2 }
  0x13   : > { %p60_p4 = scmp.ne.s32.totalorder %s697_s16, %s693_s15  ;;  %p61_p6 = scmp.eq.s32.totalorder %s416_s25, 0 }
  0x14   : > { %p831_p5 = por %p55_p2, %p54_p1  ;;  %s1033_s28 = smov (%p36_p3, %s1031_s28), 0 }
  0x15   : > { %1002 = sst [smem:[#allocation13_spill]] %s1033_s28  ;;  %s1035_s29 = smov (!%p36_p3, %s38_s29), %s725_s23 }
  0x16   : > { %p838_p7 = por %p61_p6, %p60_p4  ;;  %s112_s7 = smul.u32 %s717_s21, %s721_s22 }
  0x17   : > { %p40_p8 = scmp.ge.s32.totalorder %s1035_s29, 2  ;;  %s113_s8 = smul.u32 %s1033_s28, %s1029_s27 }
  0x18   : > { %s119_s9 = sadd.s32 1, %s689_s14  ;;  %p129_p9 = scmp.ne.s32.totalorder %s689_s14, %s685_s13 }
  0x19   : > { %s1037_s29 = smov (%p40_p8, %s1035_s29), 0  ;;  %s115_s10 = ssub.s32 %s112_s7, %s113_s8 }
  0x1a   : > { %1004 = sst [smem:[#allocation14_spill]] %s1037_s29  ;;  %p130_p10 = scmp.eq.s32.totalorder %s416_s25, 7 }
  0x1b   : > { %s42_s11 = ssub.s32 %s725_s23, %s1037_s29  ;;  %p135_p11 = scmp.ne.s32.totalorder %s685_s13, %s681_s12 }
  0x1c   : > { %s44_s15 = sor.u32 %s43_s4, %s42_s11  ;;  %s116_s30 = sor.u32 %s115_s10, %s42_s11 }
  0x1d   : > { %p45_p12 = scmp.eq.s32.totalorder %s44_s15, 0  ;;  %p117_p13 = scmp.eq.s32.totalorder %s116_s30, 0 }
  0x1e   : > { %p855_p0 = por %p130_p10, %p129_p9  ;;  %s1006_s28 = sadd.s32 4294967294, %s729_s24  }
  0x1f   : > { %p136_p1 = scmp.eq.s32.totalorder %s1006_s28, 7  ;;  %s1007_s27 = sadd.s32 1, %s701_s17 }
  0x20   : > { %s864_s22 = scalar_select %p45_p12, %s701_s17, %s1007_s27  }
  0x21   : > { %s867_s7 = scalar_select %p117_p13, %s689_s14, %s119_s9  }
  0x22   : > { %1008 = sst [smem:[#allocation15_spill]] %s864_s22  ;;  %p869_p2 = por %p136_p1, %p135_p11 }
  0x23   : > { %p448_p3 = scmp.lt.s32.totalorder %s729_s24, 8  ;;  %s162_s30 = sand.u32 1, %s701_s17  }
  0x24   : > { %s420_s4 = sshll.u32 %s162_s30, 2  ;;  %s421_s8 = sshll.u32 %s725_s23, 1 }
  0x25   : > { %s170_s10 = sadd.s32 %s717_s21, %s421_s8  ;;  %s166_s11 = scalar_lea.vmem [#allocation4], %s420_s4 }
  0x26   : > { %s176_s15 = sshll.u32 %s166_s11, 4  ;;  %s422_s29 = sshll.u32 %s170_s10, 2  ;;  %s177_s15 = int_to_ptr.vmem [resolvable:$true] %s176_s15 }
  0x27   : > { %s1010_s0 = sld [smem:[#allocation16_spill]]  ;;  %p441_p4 = pnand %p448_p3, %p831_p5 }
  0x28   : > { %p423_p6 = scmp.ge.s32.totalorder %s729_s24, 1  ;;  %s163_s22 = scalar_lea.sflag [#allocation5], %s162_s30 }
  0x29   : > { %p181_p8 = scmp.lt.s32.totalorder %s729_s24, 9 }
  0x2b   : > { %p182_p9 = pnand %p423_p6, %p181_p8 }
  0x2c   : > { %s187_s4 = sand.u32 (!%p182_p9), 1, %s697_s16  }
  0x2d   : > { %s172_s27 = scalar_lea.hbm %s1010_s0, %s422_s29  ;;  %185 = sbr.rel (%p182_p9) target bundleno = 506 (0x1fa), region = 32 }
  0x2e   : > { %s174_s9 = sshll.u32 %s172_s27, 4  ;;  %s885_s8 = sshll.u32 (!%p182_p9), %s187_s4, 2  ;;  %s175_s9 = int_to_ptr.hbm [resolvable:$true] %s174_s9 }
  0x2f   : > { %443 = dma.hbm_to_vmem [thread:$0]  (!%p441_p4), %s175_s9, 64, %s177_s15, %s163_s22  }
  0x30   : > { %s188_s10 = scalar_lea.sflag (!%p182_p9), [#allocation5], %s187_s4  ;;  %s191_s11 = scalar_lea.vmem (!%p182_p9), [#allocation4], %s885_s8 }
  0x32   : > { %672 = dma.done.wait (%p838_p7), %s188_s10, 64  }
  0x33   : > { %674 = vsyncadd (%p838_p7), %s188_s10, 4294967232  ;;  %s212_s12 = sand.u32 1, %s685_s13   ;;  %p216_p5 = scmp.eq.s32.totalorder %s709_s19, 0 }
  0x34   : > { %s896_s22 = sshll.u32 %s212_s12, 2  ;;  %p217_p10 = scmp.eq.s32.totalorder %s705_s18, 0 }
  0x35   : > { %s214_s29 = scalar_lea.vmem [#allocation7], %s896_s22 }
  0x36   : > { %p218_p11 = pnand %p217_p10, %p216_p5 }
  0x38   : > { %221 = sbr.rel (%p218_p11) target bundleno = 63 (0x3f), region = 40 }
  0x3d   : > { %vm222_vm0 = vcmask 3072   ;;  %v731_v0 = vmov 0.0  }
  0x3e   : > { %223 = vst.msk [vmem:[#allocation2] sm:$0xf] %vm222_vm0, %v731_v0 }
  0x3f PF: > { %p426_p7 = scmp.ne.s32.totalorder %s709_s19, 0 }
  0x41   : > { %226 = sbr.rel (%p426_p7) target bundleno = 191 (0xbf), region = 44 }
  0x46   : > { %v227_v1 = vld [vmem:[%s191_s11] sm:$0xf]  ;;  %vm229_vm1 = vcmask 1043456   ;;  %v228_v3 = vld [vmem:[#allocation2] sm:$0xf]  ;;  %vm234_vm2 = vcmask 3072  }
  0x47   : > { %v230_v2 = vsel %vm229_vm1, %v227_v1, 0.0 }
  0x48   : > { %231 = vadd.xlane.f32.xlu0 %v230_v2 }
  0xbb   : > { %v232_v4 = vpop.xlane.xlu0 %231 }
  0xbc   : > { %v233_v5 = vadd.f32 %v232_v4, %v228_v3 }
  0xbe   : > { %235 = vst.msk [vmem:[#allocation2] sm:$0xf] %vm234_vm2, %v233_v5 }
  0xbf PF: > { %p236_p12 = scmp.eq.s32.totalorder %s709_s19, 1 }
  0xc1   : > { %p237_p13 = pnand %p236_p12, %p217_p10 }
  0xc3   : > { %240 = sbr.rel (%p237_p13) target bundleno = 361 (0x169), region = 48 }
  0xc8   : > { %v241_v6 = vld [vmem:[#allocation2] sm:$0xf]  ;;  %vm249_vm3 = vcmask 1043456   ;;  %vm245_vm4 = vcmask 31744   ;;  %vm292_vm8 = vcmask 3072  }
  0xc9   : > { %v242_v7 = vmul.f32 0.00390625, %v241_v6  ;;  %v243_v8 = vld [vmem:[%s989_s1] sm:$0xf] }
  0xca   : > { %v244_v9 = vld [vmem:[%s990_s2] sm:$0xf] }
  0xcb   : > { %427 = vmatpush.msk.msra.mxu0 %vm249_vm3, %v242_v7 }
  0xcc   : > { %428 = vmatmul.msk.f32.vlgmr.msra.gmra.mxu0 %vm245_vm4, %v243_v8 }
 0x149   : > { %v270_v10 = vpop.f32.mrf.mxu0 }
 0x14a   : > { %v271_v11 = vadd.f32 %v270_v10, %v244_v9 }
 0x14c   : > { %v429_v12 = vmul.f32 -1.442695, %v271_v11 }
 0x14e   : > { %556 = vpow2.f32 %v429_v12 }
 0x154   : > { %v557_v13 = vpop.eup %556 }
 0x155   : > { %v276_v14 = vadd.f32 1.0, %v557_v13 }
 0x157   : > { %558 = vrcp.f32 %v276_v14  ;;  %v288_v18 = vand.u32 2147483648, %v276_v14  ;;  %v286_v20 = vand.u32 2147483647, %v276_v14  ;;  %vm282_vm6 = vweird.f32 %v276_v14 }
 0x159   : > { %v289_v22 = vor.u32 1.1754944e-38, %v288_v18  ;;  %vm287_vm9 = vcmp.eq.f32.partialorder %v286_v20, 8.507059e+37 }
 0x15d   : > { %v559_v15 = vpop.eup %558 }
 0x15e   : > { %v278_v16 = vmul.f32 %v559_v15, %v276_v14  ;;  %vm283_vm5 = vweird.f32 %v559_v15 }
 0x15f   : > { %vm284_vm7 = vmor %vm282_vm6, %vm283_vm5 }
 0x160   : > { %v279_v17 = vsub.f32 1.0, %v278_v16 }
 0x162   : > { %v280_v19 = vmul.f32 %v559_v15, %v279_v17 }
 0x164   : > { %v281_v21 = vadd.f32 %v559_v15, %v280_v19 }
 0x166   : > { %v285_v23 = vsel %vm284_vm7, %v559_v15, %v281_v21 }
 0x167   : > { %v290_v24 = vsel %vm287_vm9, %v289_v22, %v285_v23 }
 0x168   : > { %293 = vst.msk [vmem:[#allocation3] sm:$0xf] %vm292_vm8, %v290_v24 }
 0x169 PF: > { %p430_p1 = scmp.ne.s32.totalorder %s709_s19, 1 }
 0x16b   : > { %296 = sbr.rel (%p430_p1) target bundleno = 488 (0x1e8), region = 52 }
 0x170   : > { %v298_v25 = vld [vmem:[#allocation3] sm:$0xf]  ;;  %v732_v26 = vmov 0   ;;  %v297_v27 = vld [vmem:[%s191_s11] sm:$0xf] }
 0x171   : > { %560 = vset.pattern.permute.xlu0 %v732_v26 }
 0x172   : > { %301 = vperm.xlu0 %560, %v298_v25  }
 0x1e4   : > { %v302_v28 = vpop.permute.xlu0 %301 }
 0x1e5   : > { %v304_v29 = vmul.f32 %v302_v28, %v297_v27 }
 0x1e7   : > { %305 = vst [vmem:[%s214_s29] sm:$0xf] %v304_v29 }
 0x1e8 PF: > { %s314_s28 = smul.u32 %s705_s18, %s709_s19  ;;  %s432_s27 = sshll.u32 %s713_s20, 1 }
 0x1e9   : > { %s322_s9 = sshll.u32 %s214_s29, 4  ;;  %s307_s30 = scalar_lea.sflag [#allocation6], %s212_s12  ;;  %s323_s9 = int_to_ptr.vmem [resolvable:$true] %s322_s9 }
 0x1ea   : > { %s318_s4 = sadd.s32 %s432_s27, %s314_s28  ;;  %s611_s20 = scalar_lea.hbm %s991_s3, 16 }
 0x1eb   : > { %s433_s10 = sshll.u32 %s318_s4, 2 }
 0x1ec   : > { %s320_s11 = scalar_lea.hbm %s991_s3, %s433_s10 }
 0x1ed   : > { %s324_s6 = sshll.u32 %s320_s11, 4  ;;  %s325_s6 = int_to_ptr.hbm [resolvable:$true] %s324_s6 }
 0x1ee   : > { %s605_s15 = sshra.s32 %s325_s6, 4  ;;  %s606_s15 = int_to_ptr.hbm [resolvable:$true] %s605_s15 }
 0x1ef   : > { %s607_s0 = scalar_lea.hbm %s606_s15, 4  ;;  %p612_p8 = scmp.lt.s32.totalorder %s606_s15, %s991_s3 }
 0x1f0   : > { %p608_p3 = scmp.ne.s32.totalorder %s606_s15, %s607_s0  ;;  %p613_p9 = scmp.lt.s32.totalorder %s611_s20, %s607_s0 }
 0x1f2   : > { %p609_p4 = pnand %p608_p3, %p855_p0  ;;  %p614_p5 = por %p613_p9, %p612_p8 }
 0x1f4   : > { %p610_p6 = pneg %p609_p4 }
 0x1f6   : > { %p615_p10 = pnand %p614_p5, %p610_p6 }
 0x1f8   : > { %618 = shalt.err (!%p615_p10)
}
 0x1f9   : > { %438 = dma.vmem_to_hbm [thread:$0]  (%p855_p0), %s323_s9, 64, %s325_s6, %s307_s30  }
 0x1fa PF: > { %s1011_s12 = sld [smem:[#allocation10_spill]]  ;;  %p449_p11 = scmp.ge.s32.totalorder %s729_s24, 2 }
 0x1fc   : > { %p445_p7 = pnand %p449_p11, %p869_p2 }
 0x1fe   : > { %p446_p12 = pneg %p445_p7 }
 0x200   : > { %s336_s28 = sand.u32 1, %s1011_s12  }
 0x201   : > { %s337_s27 = scalar_lea.sflag [#allocation6], %s336_s28 }
 0x202   : > { %676 = dma.done.wait (%p446_p12), %s337_s27, 64  }
 0x203   : > { %678 = vsyncadd (%p446_p12), %s337_s27, 4294967232  ;;  %s19_s24 = sadd.s32 1, %s729_s24   ;;  %s1013_s26 = sld [smem:[#allocation15_spill]] }
 0x204   : > { %p944_p13 = scmp.ge.s32.totalorder %s19_s24, 10   ;;  %s1014_s19 = sld [smem:[#allocation11_spill]] }
 0x205   : > { %s1015_s25 = sld [smem:[#allocation12_spill]]  ;;  %s1018_s12 = smov %s685_s13 }
 0x206   : > { %s1016_s22 = sld [smem:[#allocation13_spill]]  ;;  %s1019_s13 = smov %s689_s14 }
 0x207   : > { %s1017_s9 = sld [smem:[#allocation14_spill]]  ;;  %s1020_s14 = smov %s867_s7 }
 0x208   : > { %s1021_s15 = smov %s697_s16  ;;  %s1022_s16 = smov %s701_s17 }
 0x209   : > { %s1023_s17 = smov %s1013_s26  ;;  %s1024_s18 = smov %s717_s21 }
 0x20a   : > { %s1025_s20 = smov %s725_s23  ;;  %18 = sbr.rel (!%p944_p13) target bundleno = 12 (0xc), region = 93 }
 0x20b   : > { %s1026_s21 = smov %s1015_s25 }
 0x20d   : > { %s1027_s23 = smov %s1017_s9 }
 0x20f   :  { %343 = vsyncpa [#allocation5], 1 }
 0x210   :  { %345 = vsyncpa [#allocation5 + $0x1], 1 }
 0x211   :  { %346 = vsyncpa [#allocation6], 1 }
 0x212   :  { %348 = vsyncpa [#allocation6 + $0x1], 1 }

</bundles_post_ra>
